<compile_context>
chip_gen: v6e
topology: v6e:2x2x1
jax: 0.10.0
libtpu: 0.0.40
codegen_flags: <defaults>
</compile_context>

<pallas_src>
import jax
import jax.numpy as jnp
from jax.experimental import pallas as pl
from jax.experimental.pallas import tpu as pltpu

IN_FEATURES = 28 * 28     # 784
OUT_FEATURES = 30
PADDED_OUT = 128          # lane-dense output width (multiple of 128)
TB_MAX = 1024             # batch-tile rows (VMEM-safe on all generations)


def linear_relu_kernel(x_ref, wt_ref, b_ref, o_ref):
    # x_ref:  (TB, 784)   VMEM  (one batch tile)
    # wt_ref: (784, 128)  VMEM  (resident, zero-padded cols 30..127)
    # b_ref:  (1, 128)    VMEM  (resident, zero-padded)
    # o_ref:  (TB, 128)   VMEM  (lane-dense store)
    acc = jnp.dot(x_ref[...], wt_ref[...], preferred_element_type=jnp.float32)
    acc = acc + b_ref[...]                       # broadcast (1,128) over rows
    o_ref[...] = jnp.maximum(acc, 0.0).astype(o_ref.dtype)


def linear_relu(x, weight, bias, *, tb_max=TB_MAX):
    """x: (B, 784) f32, weight: (30, 784) f32, bias: (30,) f32 -> (B, 30) f32."""
    B = x.shape[0]

    # Pad the output dimension to 128 lanes; transpose the weight once so the
    # kernel is a plain (TB,784) @ (784,128) MXU matmul with lane-dense tiles.
    wt = jnp.zeros((IN_FEATURES, PADDED_OUT), dtype=x.dtype)
    wt = wt.at[:, :OUT_FEATURES].set(weight.T)
    b2 = jnp.zeros((1, PADDED_OUT), dtype=jnp.float32)
    b2 = b2.at[0, :OUT_FEATURES].set(bias)

    # Batch tile: multiple of 8 sublanes, capped so double-buffered x tiles
    # stay far below the smallest (v7x) scoped-VMEM budget.
    TB = max(8, min(tb_max, ((B + 7) // 8) * 8))
    grid = (pl.cdiv(B, TB),)

    out = pl.pallas_call(
        linear_relu_kernel,
        out_shape=jax.ShapeDtypeStruct((B, PADDED_OUT), jnp.float32),
        grid_spec=pltpu.PrefetchScalarGridSpec(
            num_scalar_prefetch=0,
            grid=grid,
            in_specs=[
                pl.BlockSpec((TB, IN_FEATURES), lambda i: (i, 0)),          # x tile
                pl.BlockSpec((IN_FEATURES, PADDED_OUT), lambda i: (0, 0)),  # weight (resident)
                pl.BlockSpec((1, PADDED_OUT), lambda i: (0, 0)),            # bias (resident)
            ],
            out_specs=pl.BlockSpec((TB, PADDED_OUT), lambda i: (i, 0)),
        ),
        compiler_params=pltpu.CompilerParams(
            dimension_semantics=("parallel",),   # lets v7x shard batch tiles across both TCs
        ),
        cost_estimate=pl.CostEstimate(
            flops=2 * B * IN_FEATURES * OUT_FEATURES,
            transcendentals=0,
            bytes_accessed=(B * IN_FEATURES * 4
                            + IN_FEATURES * PADDED_OUT * 4
                            + B * PADDED_OUT * 4),
        ),
    )(x, wt, b2)

    # Drop the zero-padded lanes to recover the true (B, 30) output.
    return out[:, :OUT_FEATURES]


if __name__ == "__main__":
    key = jax.random.PRNGKey(0)
    kx, kw, kb, kx2 = jax.random.split(key, 4)

    # Deterministic parameter init (mimics torch.nn.Linear uniform init bound).
    bound = 1.0 / (IN_FEATURES ** 0.5)
    weight = jax.random.uniform(kw, (OUT_FEATURES, IN_FEATURES),
                                minval=-bound, maxval=bound, dtype=jnp.float32)
    bias = jax.random.uniform(kb, (OUT_FEATURES,),
                              minval=-bound, maxval=bound, dtype=jnp.float32)

    # Small-shape check (single grid step).
    B = 8
    x = jax.random.normal(kx, (B, IN_FEATURES), dtype=jnp.float32)
    out = jax.block_until_ready(linear_relu(x, weight, bias))
    ref = jnp.maximum(x @ weight.T + bias, 0.0)
    assert out.shape == (B, OUT_FEATURES)
    assert jnp.allclose(out, ref, atol=1e-4, rtol=1e-4)

    # Multi-step grid with a partial last tile (exercises batch tiling path).
    B2 = 300
    x2 = jax.random.normal(kx2, (B2, IN_FEATURES), dtype=jnp.float32)
    out2 = jax.block_until_ready(linear_relu(x2, weight, bias, tb_max=128))
    ref2 = jnp.maximum(x2 @ weight.T + bias, 0.0)
    assert out2.shape == (B2, OUT_FEATURES)
    assert jnp.allclose(out2, ref2, atol=1e-4, rtol=1e-4)

    print("KERNEL_OK")
</pallas_src>

<mosaic_0001>
module attributes {stable_mosaic.version = 11 : i64} {
  func.func @linear_relu_kernel(%arg0: i32, %arg1: memref<8x784xf32, #tpu.memory_space<vmem>>, %arg2: memref<784x128xf32, #tpu.memory_space<vmem>>, %arg3: memref<1x128xf32, #tpu.memory_space<vmem>>, %arg4: memref<8x128xf32, #tpu.memory_space<vmem>>) attributes {dimension_semantics = [#tpu.dimension_semantics<parallel>], iteration_bounds = array<i64: 1>, scalar_prefetch = 0 : i64, scratch_operands = 0 : i64, tpu.core_type = #tpu.core_type<tc>, window_params = [{transform_indices = @transform_0, window_bounds = array<i64: 8, 784>}, {pipeline_mode = #tpu.pipeline_mode<synchronous>, transform_indices = @transform_1, window_bounds = array<i64: 784, 128>}, {pipeline_mode = #tpu.pipeline_mode<synchronous>, transform_indices = @transform_2, window_bounds = array<i64: 1, 128>}, {transform_indices = @transform_3, window_bounds = array<i64: 8, 128>}]} {
    %c0 = arith.constant 0 : index
    %c0_0 = arith.constant 0 : index
    %0 = vector.load %arg1[%c0, %c0_0] : memref<8x784xf32, #tpu.memory_space<vmem>>, vector<8x784xf32>
    %c0_1 = arith.constant 0 : index
    %c0_2 = arith.constant 0 : index
    %1 = vector.load %arg2[%c0_1, %c0_2] : memref<784x128xf32, #tpu.memory_space<vmem>>, vector<784x128xf32>
    %cst = arith.constant dense<0.000000e+00> : vector<8x128xf32>
    %2 = tpu.matmul %0, %1, %cst {dimension_numbers = #tpu.dot_dimension_numbers<[1], [0], [0], [1], [0, 0, 1, 1], [], []>} : vector<8x784xf32>, vector<784x128xf32>, vector<8x128xf32> -> vector<8x128xf32>
    %c0_3 = arith.constant 0 : index
    %c0_4 = arith.constant 0 : index
    %3 = vector.load %arg3[%c0_3, %c0_4] : memref<1x128xf32, #tpu.memory_space<vmem>>, vector<1x128xf32>
    %4 = vector.broadcast %3 : vector<1x128xf32> to vector<8x128xf32>
    %5 = arith.addf %2, %4 : vector<8x128xf32>
    %cst_5 = arith.constant 0.000000e+00 : f32
    %6 = vector.broadcast %cst_5 : f32 to vector<8x128xf32>
    %7 = arith.maximumf %5, %6 : vector<8x128xf32>
    %c0_6 = arith.constant 0 : index
    %c0_7 = arith.constant 0 : index
    %8 = vector.load %arg4[%c0_6, %c0_7] : memref<8x128xf32, #tpu.memory_space<vmem>>, vector<8x128xf32>
    tpu.vector_store %arg4[%c0_6, %c0_7], %7 {strides = array<i32>} : memref<8x128xf32, #tpu.memory_space<vmem>>, vector<8x128xf32>,
    return
  }
  func.func @transform_0(%arg0: i32) -> (i32, i32) {
    %c0_i32 = arith.constant 0 : i32
    %c0_i32_0 = arith.constant 0 : i32
    return %arg0, %c0_i32 : i32, i32
  }
  func.func @transform_1(%arg0: i32) -> (i32, i32) {
    %c0_i32 = arith.constant 0 : i32
    %c0_i32_0 = arith.constant 0 : i32
    %c0_i32_1 = arith.constant 0 : i32
    return %c0_i32, %c0_i32_0 : i32, i32
  }
  func.func @transform_2(%arg0: i32) -> (i32, i32) {
    %c0_i32 = arith.constant 0 : i32
    %c0_i32_0 = arith.constant 0 : i32
    %c0_i32_1 = arith.constant 0 : i32
    return %c0_i32, %c0_i32_0 : i32, i32
  }
  func.func @transform_3(%arg0: i32) -> (i32, i32) {
    %c0_i32 = arith.constant 0 : i32
    %c0_i32_0 = arith.constant 0 : i32
    return %arg0, %c0_i32 : i32, i32
  }
}

</mosaic_0001>

<bundles_post_ra>
// kernel: tpu_custom_call.1
= control target key start
LH: loop header
LB: loop body
LE: loop exit
PB: predicated region body
PF: predicated region fallthrough
CT: control target
= control target key end

     0   :  { %8 = vsyncpa [#allocation3], 0  ;;  %s684_s0 = inlined_call_operand.hbm [shape: f32[8,784], index: 0, kind: input, shape index: {}]   ;;  %s685_s1 = inlined_call_operand.hbm [shape: f32[784,128], index: 1, kind: input, shape index: {}]   ;;  %s686_s2 = inlined_call_operand.vmem [shape: f32[1,128], index: 2, kind: input, shape index: {}]   ;;  %s687_s3 = inlined_call_operand.hbm [shape: f32[8,128], index: 3, kind: output, shape index: {}]  }
   0x1   :  { %9 = vsyncpa [#allocation6], 0 }
   0x2   :  { %10 = vsyncpa [#allocation4], 0  ;;  %s645_s12 = smov [#allocation2]   ;;  %s646_s14 = smov [#allocation5]  }
   0x3   :  { %s17_s13 = sshll.u32 %s645_s12, 4  ;;  %s26_s15 = sshll.u32 %s646_s14, 4  ;;  %s18_s13 = int_to_ptr.vmem [resolvable:$true] %s17_s13  ;;  %s27_s15 = int_to_ptr.vmem [resolvable:$true] %s26_s15 }
   0x4   :  { %s587_s16 = scalar_lea.vmem %s18_s13, 896  ;;  %p592_p1 = scmp.lt.s32.totalorder %s18_s13, %s18_s13 }
   0x5   :  { %p588_p0 = scmp.ne.s32.totalorder %s18_s13, %s587_s16  ;;  %p593_p2 = scmp.lt.s32.totalorder %s587_s16, %s587_s16 }
   0x7   :  { %p594_p3 = por %p593_p2, %p592_p1 }
   0x9   :  { %p595_p4 = pnand %p594_p3, %p588_p0 }
   0xb   :  { %598 = shalt.err (!%p595_p4)
}
   0xc   :  { %20 = dma.hbm_to_vmem [thread:$0]  %s684_s0, 896, %s18_s13, [#allocation3]  }
   0xd   :  { %s607_s19 = scalar_lea.vmem %s27_s15, 12544  ;;  %p612_p6 = scmp.lt.s32.totalorder %s27_s15, %s27_s15 }
   0xe   :  { %p608_p5 = scmp.ne.s32.totalorder %s27_s15, %s607_s19  ;;  %p613_p7 = scmp.lt.s32.totalorder %s607_s19, %s607_s19 }
  0x10   :  { %p614_p8 = por %p613_p7, %p612_p6 }
  0x12   :  { %p615_p9 = pnand %p614_p8, %p608_p5 }
  0x14   :  { %618 = shalt.err (!%p615_p9)
}
  0x15   :  { %s647_s20 = smov 128   ;;  %s648_s21 = smov 8  }
  0x16   :  { %32 = dma.hbm_to_vmem [thread:$0]  %s685_s1, 12544, %s27_s15, [#allocation6], %s647_s20, %s647_s20, %s648_s21  }
  0x17   :  { %639 = dma.done.wait [#allocation3], 896  }
  0x18   :  { %640 = vsyncadd [#allocation3], 4294966400 }
  0x19   :  { %641 = dma.done.wait [#allocation6], 12544  }
  0x1a   :  { %642 = vsyncadd [#allocation6], 4294954752  ;;  %v79_v0 = vld [vmem:[#allocation5 + $0xf8] sm:$0xff]  ;;  %v78_v2 = vld [vmem:[#allocation5 + $0xf0] sm:$0xff]  ;;  %vm153_vm0 = vcmask 130048   ;;  %vm650_vm1 = vmmov 0  }
  0x1b   :  { %v63_v1 = vld [vmem:[#allocation5 + $0x78] sm:$0xff]  ;;  %457 = vmatprep.subr.mxu0 %v79_v0  ;;  %v62_v4 = vld [vmem:[#allocation5 + $0x70] sm:$0xff]  ;;  %v77_v6 = vld [vmem:[#allocation5 + $0xe8] sm:$0xff]  ;;  %s651_s24 = smov [#allocation7]  }
  0x1c   :  { %v111_v3 = vld [vmem:[#allocation5 + $0x1f8] sm:$0xff]  ;;  %458 = vmatpush3.msra.mxu0 %v63_v1  ;;  %v110_v7 = vld [vmem:[#allocation5 + $0x1f0] sm:$0xff]  ;;  %v61_v8 = vld [vmem:[#allocation5 + $0x68] sm:$0xff]  ;;  %s445_s25 = sshll.u32 %s651_s24, 4  ;;  %s446_s25 = int_to_ptr.vmem [resolvable:$true] %s445_s25 }
  0x1d   :  { %v95_v5 = vld [vmem:[#allocation5 + $0x178] sm:$0xff]  ;;  %492 = vmatprep.subr.mxu1 %v111_v3  ;;  %459 = vmatprep.subr.mxu0 %v78_v2  ;;  %v94_v9 = vld [vmem:[#allocation5 + $0x170] sm:$0xff]  ;;  %v109_v10 = vld [vmem:[#allocation5 + $0x1e8] sm:$0xff]  ;;  %s619_s26 = scalar_lea.vmem %s446_s25, 128  ;;  %p624_p11 = scmp.lt.s32.totalorder %s446_s25, %s446_s25 }
  0x1e   :  { %493 = vmatpush3.msra.mxu1 %v95_v5  ;;  %460 = vmatpush3.msra.mxu0 %v62_v4  ;;  %v76_v11 = vld [vmem:[#allocation5 + $0xe0] sm:$0xff]  ;;  %v93_v12 = vld [vmem:[#allocation5 + $0x168] sm:$0xff]  ;;  %v75_v15 = vld [vmem:[#allocation5 + $0xd8] sm:$0xff]  ;;  %p620_p10 = scmp.ne.s32.totalorder %s446_s25, %s619_s26  ;;  %p625_p12 = scmp.lt.s32.totalorder %s619_s26, %s619_s26 }
  0x1f   :  { %494 = vmatprep.subr.mxu1 %v110_v7  ;;  %461 = vmatprep.subr.mxu0 %v77_v6  ;;  %v60_v13 = vld [vmem:[#allocation5 + $0x60] sm:$0xff]  ;;  %v59_v17 = vld [vmem:[#allocation5 + $0x58] sm:$0xff]  ;;  %v74_v19 = vld [vmem:[#allocation5 + $0xd0] sm:$0xff] }
  0x20   :  { %495 = vmatpush3.msra.mxu1 %v94_v9  ;;  %v108_v14 = vld [vmem:[#allocation5 + $0x1e0] sm:$0xff]  ;;  %462 = vmatpush3.msra.mxu0 %v61_v8  ;;  %v107_v18 = vld [vmem:[#allocation5 + $0x1d8] sm:$0xff]  ;;  %v58_v21 = vld [vmem:[#allocation5 + $0x50] sm:$0xff]  ;;  %p626_p13 = por %p625_p12, %p624_p11 }
  0x21   :  { %496 = vmatprep.subr.mxu1 %v109_v10  ;;  %v92_v16 = vld [vmem:[#allocation5 + $0x160] sm:$0xff]  ;;  %463 = vmatprep.subr.mxu0 %v76_v11  ;;  %v91_v20 = vld [vmem:[#allocation5 + $0x158] sm:$0xff]  ;;  %v106_v22 = vld [vmem:[#allocation5 + $0x1d0] sm:$0xff] }
  0x22   :  { %497 = vmatpush3.msra.mxu1 %v93_v12  ;;  %464 = vmatpush3.msra.mxu0 %v60_v13  ;;  %v73_v23 = vld [vmem:[#allocation5 + $0xc8] sm:$0xff]  ;;  %v90_v24 = vld [vmem:[#allocation5 + $0x150] sm:$0xff]  ;;  %v72_v27 = vld [vmem:[#allocation5 + $0xc0] sm:$0xff]  ;;  %p627_p0 = pnand %p626_p13, %p620_p10 }
  0x23   :  { %498 = vmatprep.subr.mxu1 %v108_v14  ;;  %465 = vmatprep.subr.mxu0 %v75_v15  ;;  %v57_v25 = vld [vmem:[#allocation5 + $0x48] sm:$0xff]  ;;  %v56_v29 = vld [vmem:[#allocation5 + $0x40] sm:$0xff]  ;;  %v71_v31 = vld [vmem:[#allocation5 + $0xb8] sm:$0xff]  ;;  %v649_v14 = vmov 0.0  }
  0x24   :  { %499 = vmatpush3.msra.mxu1 %v92_v16  ;;  %466 = vmatpush3.msra.mxu0 %v59_v17  ;;  %v105_v26 = vld [vmem:[#allocation5 + $0x1c8] sm:$0xff]  ;;  %v104_v30 = vld [vmem:[#allocation5 + $0x1c0] sm:$0xff]  ;;  %v55_v33 = vld [vmem:[#allocation5 + $0x38] sm:$0xff] }
  0x25   :  { %500 = vmatprep.subr.mxu1 %v107_v18  ;;  %467 = vmatprep.subr.mxu0 %v74_v19  ;;  %v89_v28 = vld [vmem:[#allocation5 + $0x148] sm:$0xff]  ;;  %v88_v32 = vld [vmem:[#allocation5 + $0x140] sm:$0xff]  ;;  %v103_v34 = vld [vmem:[#allocation5 + $0x1b8] sm:$0xff] }
  0x26   :  { %501 = vmatpush3.msra.mxu1 %v91_v20  ;;  %468 = vmatpush3.msra.mxu0 %v58_v21  ;;  %v70_v35 = vld [vmem:[#allocation5 + $0xb0] sm:$0xff]  ;;  %v87_v36 = vld [vmem:[#allocation5 + $0x138] sm:$0xff]  ;;  %v69_v39 = vld [vmem:[#allocation5 + $0xa8] sm:$0xff] }
  0x27   :  { %502 = vmatprep.subr.mxu1 %v106_v22  ;;  %469 = vmatprep.subr.mxu0 %v73_v23  ;;  %v54_v37 = vld [vmem:[#allocation5 + $0x30] sm:$0xff]  ;;  %v53_v41 = vld [vmem:[#allocation5 + $0x28] sm:$0xff]  ;;  %v68_v43 = vld [vmem:[#allocation5 + $0xa0] sm:$0xff] }
  0x28   :  { %503 = vmatpush3.msra.mxu1 %v90_v24  ;;  %470 = vmatpush3.msra.mxu0 %v57_v25  ;;  %v102_v38 = vld [vmem:[#allocation5 + $0x1b0] sm:$0xff]  ;;  %v101_v42 = vld [vmem:[#allocation5 + $0x1a8] sm:$0xff]  ;;  %v52_v45 = vld [vmem:[#allocation5 + $0x20] sm:$0xff] }
  0x29   :  { %504 = vmatprep.subr.mxu1 %v105_v26  ;;  %471 = vmatprep.subr.mxu0 %v72_v27  ;;  %v86_v40 = vld [vmem:[#allocation5 + $0x130] sm:$0xff]  ;;  %v85_v44 = vld [vmem:[#allocation5 + $0x128] sm:$0xff]  ;;  %v100_v46 = vld [vmem:[#allocation5 + $0x1a0] sm:$0xff] }
  0x2a   :  { %505 = vmatpush3.msra.mxu1 %v89_v28  ;;  %472 = vmatpush3.msra.mxu0 %v56_v29  ;;  %v67_v47 = vld [vmem:[#allocation5 + $0x98] sm:$0xff]  ;;  %v84_v48 = vld [vmem:[#allocation5 + $0x120] sm:$0xff]  ;;  %v66_v51 = vld [vmem:[#allocation5 + $0x90] sm:$0xff] }
  0x2b   :  { %506 = vmatprep.subr.mxu1 %v104_v30  ;;  %473 = vmatprep.subr.mxu0 %v71_v31  ;;  %v51_v49 = vld [vmem:[#allocation5 + $0x18] sm:$0xff]  ;;  %v50_v53 = vld [vmem:[#allocation5 + $0x10] sm:$0xff]  ;;  %v65_v55 = vld [vmem:[#allocation5 + $0x88] sm:$0xff] }
  0x2c   :  { %507 = vmatpush3.msra.mxu1 %v88_v32  ;;  %474 = vmatpush3.msra.mxu0 %v55_v33  ;;  %v99_v50 = vld [vmem:[#allocation5 + $0x198] sm:$0xff]  ;;  %v98_v54 = vld [vmem:[#allocation5 + $0x190] sm:$0xff]  ;;  %v49_v57 = vld [vmem:[#allocation5 + $0x8] sm:$0xff] }
  0x2d   :  { %508 = vmatprep.subr.mxu1 %v103_v34  ;;  %475 = vmatprep.subr.mxu0 %v70_v35  ;;  %v83_v52 = vld [vmem:[#allocation5 + $0x118] sm:$0xff]  ;;  %v82_v56 = vld [vmem:[#allocation5 + $0x110] sm:$0xff]  ;;  %v97_v58 = vld [vmem:[#allocation5 + $0x188] sm:$0xff] }
  0x2e   :  { %509 = vmatpush3.msra.mxu1 %v87_v36  ;;  %476 = vmatpush3.msra.mxu0 %v54_v37  ;;  %v64_v59 = vld [vmem:[#allocation5 + $0x80] sm:$0xff]  ;;  %v42_v60 = vld [vmem:[#allocation2 + $0x8] sm:$0xff]  ;;  %v81_v62 = vld [vmem:[#allocation5 + $0x108] sm:$0xff] }
  0x2f   :  { %510 = vmatprep.subr.mxu1 %v102_v38  ;;  %477 = vmatprep.subr.mxu0 %v69_v39  ;;  %v48_v61 = vld [vmem:[#allocation5] sm:$0xff]  ;;  %v41_v63 = vld [vmem:[#allocation2] sm:$0xff]  ;;  %v143_v1 = vld [vmem:[#allocation5 + $0x2f8] sm:$0xff] }
  0x30   :  { %511 = vmatpush3.msra.mxu1 %v86_v40  ;;  %478 = vmatpush3.msra.mxu0 %v53_v41  ;;  %v96_v0 = vld [vmem:[#allocation5 + $0x180] sm:$0xff]  ;;  %v127_v4 = vld [vmem:[#allocation5 + $0x278] sm:$0xff]  ;;  %v142_v6 = vld [vmem:[#allocation5 + $0x2f0] sm:$0xff] }
  0x31   :  { %512 = vmatprep.subr.mxu1 %v101_v42  ;;  %479 = vmatprep.subr.mxu0 %v68_v43  ;;  %v80_v2 = vld [vmem:[#allocation5 + $0x100] sm:$0xff]  ;;  %v43_v5 = vld [vmem:[#allocation2 + $0x10] sm:$0xff]  ;;  %v126_v7 = vld [vmem:[#allocation5 + $0x270] sm:$0xff] }
  0x32   :  { %513 = vmatpush3.msra.mxu1 %v85_v44  ;;  %480 = vmatpush3.msra.mxu0 %v52_v45  ;;  %v44_v3 = vld [vmem:[#allocation2 + $0x18] sm:$0xff]  ;;  %v46_v8 = vld [vmem:[#allocation2 + $0x28] sm:$0xff]  ;;  %v141_v9 = vld [vmem:[#allocation5 + $0x2e8] sm:$0xff] }
  0x33   :  { %514 = vmatprep.subr.mxu1 %v100_v46  ;;  %481 = vmatprep.subr.mxu0 %v67_v47  ;;  %v125_v10 = vld [vmem:[#allocation5 + $0x268] sm:$0xff]  ;;  %v140_v12 = vld [vmem:[#allocation5 + $0x2e0] sm:$0xff]  ;;  %v139_v16 = vld [vmem:[#allocation5 + $0x2d8] sm:$0xff] }
  0x34   :  { %515 = vmatpush3.msra.mxu1 %v84_v48  ;;  %482 = vmatpush3.msra.mxu0 %v51_v49  ;;  %v145_v11 = vld [vmem:[#allocation5 + $0x308] sm:$0xff]  ;;  %v124_v13 = vld [vmem:[#allocation5 + $0x260] sm:$0xff]  ;;  %v123_v17 = vld [vmem:[#allocation5 + $0x258] sm:$0xff] }
  0x35   :  { %516 = vmatprep.subr.mxu1 %v99_v50  ;;  %483 = vmatprep.subr.mxu0 %v66_v51  ;;  %v144_v15 = vld [vmem:[#allocation5 + $0x300] sm:$0xff]  ;;  %v47_v18 = vld [vmem:[#allocation2 + $0x30] sm:$0xff]  ;;  %v138_v19 = vld [vmem:[#allocation5 + $0x2d0] sm:$0xff] }
  0x36   :  { %517 = vmatpush3.msra.mxu1 %v83_v52  ;;  %484 = vmatpush3.msra.mxu0 %v50_v53  ;;  %v122_v20 = vld [vmem:[#allocation5 + $0x250] sm:$0xff]  ;;  %v137_v21 = vld [vmem:[#allocation5 + $0x2c8] sm:$0xff]  ;;  %v136_v23 = vld [vmem:[#allocation5 + $0x2c0] sm:$0xff] }
  0x37   :  { %518 = vmatprep.subr.mxu1 %v98_v54  ;;  %485 = vmatprep.subr.mxu0 %v65_v55  ;;  %v121_v22 = vld [vmem:[#allocation5 + $0x248] sm:$0xff]  ;;  %v120_v24 = vld [vmem:[#allocation5 + $0x240] sm:$0xff]  ;;  %v135_v25 = vld [vmem:[#allocation5 + $0x2b8] sm:$0xff] }
  0x38   :  { %519 = vmatpush3.msra.mxu1 %v82_v56  ;;  %486 = vmatpush3.msra.mxu0 %v49_v57  ;;  %v119_v26 = vld [vmem:[#allocation5 + $0x238] sm:$0xff]  ;;  %v134_v27 = vld [vmem:[#allocation5 + $0x2b0] sm:$0xff]  ;;  %v133_v29 = vld [vmem:[#allocation5 + $0x2a8] sm:$0xff] }
  0x39   :  { %520 = vmatprep.subr.mxu1 %v97_v58  ;;  %487 = vmatprep.subr.mxu0 %v64_v59  ;;  %v118_v28 = vld [vmem:[#allocation5 + $0x230] sm:$0xff]  ;;  %v117_v30 = vld [vmem:[#allocation5 + $0x228] sm:$0xff]  ;;  %v132_v31 = vld [vmem:[#allocation5 + $0x2a0] sm:$0xff] }
  0x3a   :  { %221 = vmatprep.mubr.f32.mxu0 %v42_v60  ;;  %488 = vmatpush3.msra.mxu0 %v48_v61  ;;  %v116_v32 = vld [vmem:[#allocation5 + $0x220] sm:$0xff]  ;;  %v131_v33 = vld [vmem:[#allocation5 + $0x298] sm:$0xff]  ;;  %v130_v35 = vld [vmem:[#allocation5 + $0x290] sm:$0xff] }
  0x3b   :  { %521 = vmatpush3.msra.mxu1 %v81_v62  ;;  %222 = vmatmul.mubr.f32.vlgmr.msra.gmra.mxu0 %v41_v63  ;;  %v115_v34 = vld [vmem:[#allocation5 + $0x218] sm:$0xff]  ;;  %v114_v36 = vld [vmem:[#allocation5 + $0x210] sm:$0xff]  ;;  %v129_v37 = vld [vmem:[#allocation5 + $0x288] sm:$0xff] }
  0x3c   :  { %522 = vmatprep.subr.mxu1 %v96_v0  ;;  %527 = vmatprep.subr.mxu0 %v143_v1  ;;  %v113_v38 = vld [vmem:[#allocation5 + $0x208] sm:$0xff]  ;;  %v128_v39 = vld [vmem:[#allocation5 + $0x280] sm:$0xff] }
  0x3d   :  { %523 = vmatpush3.msra.mxu1 %v80_v2  ;;  %291 = vmatprep.mubr.f32.mxu1 %v44_v3  ;;  %v112_v40 = vld [vmem:[#allocation5 + $0x200] sm:$0xff]  ;;  %v45_v41 = vld [vmem:[#allocation2 + $0x20] sm:$0xff] }
  0x3e   :  { %528 = vmatpush3.msra.mxu0 %v127_v4  ;;  %292 = vmatmul.mubr.f32.vlgmr.msra.gmra.mxu1 %v43_v5  ;;  %v455_v49 = vld [vmem:[%s686_s2] ss:$0 sm:$0xff] }
  0x3f   :  { %529 = vmatprep.subr.mxu0 %v142_v6  ;;  %361 = vmatprep.mubr.f32.mxu0 %v46_v8 }
  0x40   :  { %530 = vmatpush3.msra.mxu0 %v126_v7  ;;  %565 = vmatprep.subr.mxu1 %v649_v14 }
  0x41   :  { %531 = vmatprep.subr.mxu0 %v141_v9  ;;  %566 = vmatpush3.msra.mxu1 %v145_v11 }
  0x42   :  { %532 = vmatpush3.msra.mxu0 %v125_v10  ;;  %567 = vmatprep.subr.mxu1 %v649_v14 }
  0x43   :  { %533 = vmatprep.subr.mxu0 %v140_v12  ;;  %568 = vmatpush3.msra.mxu1 %v144_v15 }
  0x44   :  { %534 = vmatpush3.msra.mxu0 %v124_v13  ;;  %569 = vmatprep.mubr.msk.f32.mxu1 %vm650_vm1, %v649_v14 }
  0x45   :  { %535 = vmatprep.subr.mxu0 %v139_v16  ;;  %570 = vmatmul.mubr.msk.f32.vlgmr.msra.gmra.mxu1 %vm153_vm0, %v47_v18 }
  0x46   :  { %536 = vmatpush3.msra.mxu0 %v123_v17 }
  0x47   :  { %537 = vmatprep.subr.mxu0 %v138_v19 }
  0x48   :  { %538 = vmatpush3.msra.mxu0 %v122_v20 }
  0x49   :  { %539 = vmatprep.subr.mxu0 %v137_v21 }
  0x4a   :  { %540 = vmatpush3.msra.mxu0 %v121_v22 }
  0x4b   :  { %541 = vmatprep.subr.mxu0 %v136_v23 }
  0x4c   :  { %542 = vmatpush3.msra.mxu0 %v120_v24 }
  0x4d   :  { %543 = vmatprep.subr.mxu0 %v135_v25 }
  0x4e   :  { %544 = vmatpush3.msra.mxu0 %v119_v26 }
  0x4f   :  { %545 = vmatprep.subr.mxu0 %v134_v27 }
  0x50   :  { %546 = vmatpush3.msra.mxu0 %v118_v28 }
  0x51   :  { %547 = vmatprep.subr.mxu0 %v133_v29 }
  0x52   :  { %548 = vmatpush3.msra.mxu0 %v117_v30 }
  0x53   :  { %549 = vmatprep.subr.mxu0 %v132_v31 }
  0x54   :  { %550 = vmatpush3.msra.mxu0 %v116_v32 }
  0x55   :  { %551 = vmatprep.subr.mxu0 %v131_v33 }
  0x56   :  { %552 = vmatpush3.msra.mxu0 %v115_v34 }
  0x57   :  { %553 = vmatprep.subr.mxu0 %v130_v35 }
  0x58   :  { %554 = vmatpush3.msra.mxu0 %v114_v36 }
  0x59   :  { %555 = vmatprep.subr.mxu0 %v129_v37 }
  0x5a   :  { %556 = vmatpush3.msra.mxu0 %v113_v38 }
  0x5b   :  { %557 = vmatprep.subr.mxu0 %v128_v39 }
  0x5c   :  { %558 = vmatpush3.msra.mxu0 %v112_v40 }
  0x5d   :  { %362 = vmatmul.mubr.f32.vlgmr.msra.gmra.mxu0 %v45_v41 }
  0xfb   :  { %v489_v46 = vpop.f32.mrf.mxu0 }
  0xfd   :  { %v490_v47 = vpop.f32.mrf.mxu0 }
  0xfe   :  { %v524_v42 = vpop.f32.mrf.mxu1  ;;  %v491_v48 = vadd.f32 %v490_v47, %v489_v46 }
 0x100   :  { %v525_v43 = vpop.f32.mrf.mxu1  ;;  %v224_v50 = vadd.f32 %v491_v48, %v455_v49 }
 0x101   :  { %v526_v51 = vadd.f32 %v525_v43, %v524_v42 }
 0x103   :  { %v294_v54 = vadd.f32 %v526_v51, %v224_v50 }
 0x105   :  { %v433_v44 = vpop.f32.mrf.mxu1 }
 0x107   :  { %v571_v45 = vpop.f32.mrf.mxu1 }
 0x11d   :  { %v559_v52 = vpop.f32.mrf.mxu0 }
 0x11f   :  { %v560_v53 = vpop.f32.mrf.mxu0 }
 0x120   :  { %v561_v55 = vadd.f32 %v560_v53, %v559_v52 }
 0x122   :  { %v364_v56 = vadd.f32 %v561_v55, %v294_v54 }
 0x124   :  { %v434_v57 = vadd.f32 %v433_v44, %v364_v56 }
 0x126   :  { %v437_v58 = vmax.f32 %v434_v57, 0.0 }
 0x128   :  { %438 = vst [vmem:[#allocation7] sm:$0xff] %v437_v58 }
 0x129   :  { %630 = shalt.err (!%p627_p0)
}
 0x12a   :  { %448 = dma.vmem_to_hbm [thread:$0]  %s446_s25, 128, %s687_s3, [#allocation4]  }
 0x12b   :  { %643 = dma.done.wait [#allocation4], 128  }
 0x12c   :  { %644 = vsyncadd [#allocation4], 4294967168 }
 0x12d   :  { %452 = vsyncpa [#allocation3], 1 }
 0x12e   :  { %453 = vsyncpa [#allocation6], 1 }
 0x12f   :  { %454 = vsyncpa [#allocation4], 1 }

</bundles_post_ra>
